<compile_context>
chip_gen: v5e
topology: v5e:2x2
jax: 0.10.0
libtpu: 0.0.40
codegen_flags: <defaults>
</compile_context>

<pallas_src>
import jax
import jax.numpy as jnp
from jax.experimental import pallas as pl
from jax.experimental.pallas import tpu as pltpu


def _mish_kernel(x_ref, o_ref):
    xf = x_ref[...].astype(jnp.float32)
    # Exact identity: tanh(softplus(x)) == (e^2 + 2e) / (e^2 + 2e + 2), e = exp(x).
    # Clamp the exp argument at 20: exp(20) ~ 4.85e8, so num/(num+2) rounds to
    # exactly 1.0f and the exact divide returns xf unchanged for x > 20 — no
    # saturation select needed.  The divide stays exact (VPU-side Newton) rather
    # than pl.reciprocal(approx=True), which would add a second EUP op per element
    # on top of exp and could make v7x EUP-bound.
    e = jnp.exp(jnp.minimum(xf, 20.0))
    num = e * (e + 2.0)
    o_ref[...] = (xf * (num / (num + 2.0))).astype(o_ref.dtype)


_LANES = 128
_TARGET_BLOCK_BYTES = 6 << 20    # ~6 MiB block; 2 in + 2 out buffers = 24 MiB VMEM
_MIN_TILE_ROWS = 512             # floor: medium inputs still get a real pipeline
_VMEM_LIMIT_BYTES = 48 << 20     # > buffers + headroom; <= 64 MiB/TC on v7x
_SMALL_N = 1 << 20               # below ~1M elems a fused XLA expression wins


def _round_up(a, b):
    return ((a + b - 1) // b) * b


def _round_down(a, b):
    return (a // b) * b


def _mish_jnp(x):
    # Same single-exp identity as the kernel (1 transcendental, consistent numerics).
    xf = x.astype(jnp.float32)
    e = jnp.exp(jnp.minimum(xf, 20.0))
    num = e * (e + 2.0)
    return (xf * (num / (num + 2.0))).astype(x.dtype)


def mish(x, *, force_pallas=False, tile_rows=None):
    """Elementwise Mish: x * tanh(softplus(x)). Floating dtypes; shape/dtype preserved."""
    n = x.size
    # Fast paths: tiny inputs (launch overhead dominates) or a flat size that is
    # not a multiple of 128 lanes (padding would cost an extra full HBM pass for
    # a kernel whose whole cost is HBM traffic).
    if n == 0 or n % _LANES != 0 or (n < _SMALL_N and not force_pallas):
        return _mish_jnp(x)

    rows = n // _LANES
    x2d = x.reshape(rows, _LANES)            # contiguous flatten: no data movement

    itemsize = jnp.dtype(x.dtype).itemsize
    sublane = max(8, 32 // itemsize)         # packed-row multiple: 8 f32, 16 bf16, 32 int8

    if tile_rows is not None:
        row_tile = tile_rows                 # test/tuning override
    elif rows <= _MIN_TILE_ROWS:
        row_tile = rows                      # single block equal to the full dim
    else:
        # Aim for >= 8 grid steps (keeps both v7x cores fed and the pipeline in
        # steady state), capped at ~6 MiB per block, floored at 512 rows, and
        # rounded to the dtype's packed-sublane multiple.
        max_tile_rows = _round_down(_TARGET_BLOCK_BYTES // (_LANES * itemsize), sublane)
        row_tile = _round_up(pl.cdiv(rows, 8), sublane)
        row_tile = max(_MIN_TILE_ROWS, min(row_tile, max_tile_rows))

    grid = (pl.cdiv(rows, row_tile),)

    cost = pl.CostEstimate(
        flops=6 * n,
        transcendentals=n,
        bytes_accessed=2 * n * itemsize,
    )

    # NOTE: input pipeline depth is left at the default 2 buffers; at ~6 MiB per
    # block each step is long enough (even at v7x's 3.2 TB/s) that double
    # buffering already hides the DMA.  pipeline_mode=pl.Buffered(3) is the next
    # knob if an xprof trace still shows exposed input DMA on v7x.
    out2d = pl.pallas_call(
        _mish_kernel,
        out_shape=jax.ShapeDtypeStruct((rows, _LANES), x.dtype),
        grid_spec=pltpu.PrefetchScalarGridSpec(
            num_scalar_prefetch=0,
            grid=grid,
            in_specs=[pl.BlockSpec((row_tile, _LANES), lambda i: (i, 0))],
            out_specs=pl.BlockSpec((row_tile, _LANES), lambda i: (i, 0)),
        ),
        compiler_params=pltpu.CompilerParams(
            dimension_semantics=("parallel",),
            vmem_limit_bytes=_VMEM_LIMIT_BYTES,
        ),
        cost_estimate=cost,
    )(x2d)

    return out2d.reshape(x.shape)


def mish_ref(x):
    # Reference in the original tanh(softplus(x)) form (validates the identity).
    xf = x.astype(jnp.float32)
    return (xf * jnp.tanh(jax.nn.softplus(xf))).astype(x.dtype)


if __name__ == "__main__":
    key = jax.random.PRNGKey(0)
    k0, k1, k2 = jax.random.split(key, 3)

    # 1) Small NCHW input matching the module's typical use: batch=2, channels=4, 16x16.
    #    16 rows -> single full-dim block.
    x = jax.random.normal(k0, (2, 4, 16, 16), dtype=jnp.float32) * 3.0
    y = jax.block_until_ready(mish(x, force_pallas=True))
    y_ref = mish_ref(x)
    assert y.shape == x.shape and y.dtype == x.dtype
    assert jnp.allclose(y, y_ref, atol=1e-5, rtol=1e-5)

    # 2) Multi-step grid with a ragged final row-block at a small size:
    #    4*4*20*40 = 12800 elems -> 100 rows; tile_rows=56 -> grid=2, last block masked.
    x2 = jax.random.normal(k1, (4, 4, 20, 40), dtype=jnp.float32) * 4.0
    y2 = jax.block_until_ready(mish(x2, force_pallas=True, tile_rows=56))
    y2_ref = mish_ref(x2)
    assert y2.shape == x2.shape and y2.dtype == x2.dtype
    assert jnp.allclose(y2, y2_ref, atol=1e-5, rtol=1e-5)

    # 3) bf16 path (dtype-aware sublane handling, single block at this size).
    x3 = (jax.random.normal(k2, (2, 4, 16, 16), dtype=jnp.float32) * 3.0).astype(jnp.bfloat16)
    y3 = jax.block_until_ready(mish(x3, force_pallas=True))
    y3_ref = mish_ref(x3)
    assert y3.shape == x3.shape and y3.dtype == x3.dtype
    assert jnp.allclose(y3.astype(jnp.float32), y3_ref.astype(jnp.float32), atol=2e-2, rtol=2e-2)

    print("KERNEL_OK")
</pallas_src>

<mosaic_0001>
module attributes {stable_mosaic.version = 11 : i64} {
  func.func @_mish_kernel(%arg0: i32, %arg1: memref<16x128xf32, #tpu.memory_space<vmem>>, %arg2: memref<16x128xf32, #tpu.memory_space<vmem>>) attributes {dimension_semantics = [#tpu.dimension_semantics<parallel>], iteration_bounds = array<i64: 1>, scalar_prefetch = 0 : i64, scratch_operands = 0 : i64, tpu.core_type = #tpu.core_type<tc>, window_params = [{transform_indices = @transform_0, window_bounds = array<i64: 16, 128>}, {transform_indices = @transform_1, window_bounds = array<i64: 16, 128>}]} {
    %c0 = arith.constant 0 : index
    %c0_0 = arith.constant 0 : index
    %0 = vector.load %arg1[%c0, %c0_0] : memref<16x128xf32, #tpu.memory_space<vmem>>, vector<16x128xf32>
    %cst = arith.constant 2.000000e+01 : f32
    %1 = vector.broadcast %cst : f32 to vector<16x128xf32>
    %2 = arith.minimumf %0, %1 : vector<16x128xf32>
    %3 = math.exp %2 : vector<16x128xf32>
    %cst_1 = arith.constant 2.000000e+00 : f32
    %4 = vector.broadcast %cst_1 : f32 to vector<16x128xf32>
    %5 = arith.addf %3, %4 : vector<16x128xf32>
    %6 = arith.mulf %3, %5 : vector<16x128xf32>
    %cst_2 = arith.constant 2.000000e+00 : f32
    %7 = vector.broadcast %cst_2 : f32 to vector<16x128xf32>
    %8 = arith.addf %6, %7 : vector<16x128xf32>
    %9 = arith.divf %6, %8 : vector<16x128xf32>
    %10 = arith.mulf %0, %9 : vector<16x128xf32>
    %c0_3 = arith.constant 0 : index
    %c0_4 = arith.constant 0 : index
    %11 = vector.load %arg2[%c0_3, %c0_4] : memref<16x128xf32, #tpu.memory_space<vmem>>, vector<16x128xf32>
    tpu.vector_store %arg2[%c0_3, %c0_4], %10 {strides = array<i32>} : memref<16x128xf32, #tpu.memory_space<vmem>>, vector<16x128xf32>,
    return
  }
  func.func @transform_0(%arg0: i32) -> (i32, i32) {
    %c0_i32 = arith.constant 0 : i32
    %c0_i32_0 = arith.constant 0 : i32
    return %arg0, %c0_i32 : i32, i32
  }
  func.func @transform_1(%arg0: i32) -> (i32, i32) {
    %c0_i32 = arith.constant 0 : i32
    %c0_i32_0 = arith.constant 0 : i32
    return %arg0, %c0_i32 : i32, i32
  }
}

</mosaic_0001>

<bundles_post_ra>
// kernel: tpu_custom_call.1
= control target key start
LH: loop header
LB: loop body
LE: loop exit
PB: predicated region body
PF: predicated region fallthrough
CT: control target
= control target key end

     0   :  { %6 = vsyncpa [#allocation3], 0  ;;  %s182_s0 = inlined_call_operand.hbm [shape: f32[16,128], index: 0, kind: input, shape index: {}]   ;;  %s183_s1 = inlined_call_operand.hbm [shape: f32[16,128], index: 1, kind: output, shape index: {}]  }
   0x1   :  { %7 = vsyncpa [#allocation4], 0  ;;  %s12_s8 = sshll.u32 %s182_s0, 4  ;;  %s156_s9 = smov [#allocation2]   ;;  %s13_s8 = int_to_ptr.hbm [resolvable:$true] %s12_s8 }
   0x2   :  { %s14_s10 = sshll.u32 %s156_s9, 4  ;;  %s157_s11 = smov 128   ;;  %s15_s10 = int_to_ptr.vmem [resolvable:$true] %s14_s10 }
   0x3   :  { %s158_s12 = smov 8  }
   0x4   :  { %20 = dma.hbm_to_vmem [thread:$0]  %s13_s8, 256, %s15_s10, [#allocation3], %s157_s11, %s157_s11, %s158_s12  }
   0x5   :  { %152 = dma.done.wait [#allocation3], 256  }
   0x6   :  { %153 = vsyncadd [#allocation3], 4294967040  ;;  %v25_v0 = vld [vmem:[#allocation2] sm:$0xff]  ;;  %v26_v1 = vld [vmem:[#allocation2 + $0x8] sm:$0xff]  ;;  %s159_s0 = smov [#allocation5]   ;;  %s79_s16 = sshll.u32 %s183_s1, 4  ;;  %s80_s16 = int_to_ptr.hbm [resolvable:$true] %s79_s16 }
   0x7   :  { %v27_v2 = vmin.f32 %v25_v0, 20.0  ;;  %v28_v3 = vmin.f32 %v26_v1, 20.0  ;;  %s77_s13 = sshll.u32 %s159_s0, 4  ;;  %s78_s13 = int_to_ptr.vmem [resolvable:$true] %s77_s13 }
   0x9   :  { %v29_v4 = vmul.f32 1.442695, %v27_v2  ;;  %v31_v5 = vmul.f32 1.442695, %v28_v3 }
   0xb   :  { %96 = vpow2.f32 %v29_v4 }
   0xc   :  { %98 = vpow2.f32 %v31_v5 }
  0x11   :  { %v97_v6 = vpop.eup %96 }
  0x12   :  { %v99_v7 = vpop.eup %98  ;;  %v33_v8 = vadd.f32 2.0, %v97_v6 }
  0x13   :  { %v34_v9 = vadd.f32 2.0, %v99_v7 }
  0x14   :  { %v35_v10 = vmul.f32 %v97_v6, %v33_v8 }
  0x15   :  { %v36_v11 = vmul.f32 %v99_v7, %v34_v9 }
  0x16   :  { %v37_v12 = vadd.f32 2.0, %v35_v10 }
  0x17   :  { %v38_v13 = vadd.f32 2.0, %v36_v11 }
  0x18   :  { %100 = vrcp.f32 %v37_v12  ;;  %vm44_vm0 = vweird.f32 %v37_v12  ;;  %v50_v17 = vand.u32 2147483648, %v37_v12  ;;  %v48_v20 = vand.u32 2147483647, %v37_v12 }
  0x19   :  { %102 = vrcp.f32 %v38_v13  ;;  %v65_v21 = vand.u32 2147483648, %v38_v13  ;;  %vm59_vm2 = vweird.f32 %v38_v13  ;;  %v63_v23 = vand.u32 2147483647, %v38_v13 }
  0x1a   :  { %v51_v25 = vor.u32 1.1754944e-38, %v50_v17  ;;  %vm49_vm5 = vcmp.eq.f32.partialorder %v48_v20, 8.507059e+37 }
  0x1b   :  { %v66_v28 = vor.u32 1.1754944e-38, %v65_v21  ;;  %vm64_vm7 = vcmp.eq.f32.partialorder %v63_v23, 8.507059e+37 }
  0x1e   :  { %v101_v14 = vpop.eup %100 }
  0x1f   :  { %v103_v15 = vpop.eup %102  ;;  %v40_v16 = vmul.f32 %v101_v14, %v37_v12  ;;  %vm45_vm1 = vweird.f32 %v101_v14 }
  0x20   :  { %v55_v18 = vmul.f32 %v103_v15, %v38_v13  ;;  %vm60_vm3 = vweird.f32 %v103_v15  ;;  %vm46_vm4 = vmor %vm44_vm0, %vm45_vm1 }
  0x21   :  { %v41_v19 = vsub.f32 1.0, %v40_v16  ;;  %vm61_vm6 = vmor %vm59_vm2, %vm60_vm3 }
  0x22   :  { %v56_v22 = vsub.f32 1.0, %v55_v18 }
  0x23   :  { %v42_v24 = vmul.f32 %v101_v14, %v41_v19 }
  0x24   :  { %v57_v26 = vmul.f32 %v103_v15, %v56_v22 }
  0x25   :  { %v43_v27 = vadd.f32 %v101_v14, %v42_v24 }
  0x26   :  { %v58_v29 = vadd.f32 %v103_v15, %v57_v26 }
  0x27   :  { %v47_v30 = vsel %vm46_vm4, %v101_v14, %v43_v27 }
  0x28   :  { %v52_v31 = vsel %vm49_vm5, %v51_v25, %v47_v30  ;;  %v62_v32 = vsel %vm61_vm6, %v103_v15, %v58_v29 }
  0x29   :  { %v53_v33 = vmul.f32 %v52_v31, %v35_v10  ;;  %v67_v34 = vsel %vm64_vm7, %v66_v28, %v62_v32 }
  0x2a   :  { %v68_v35 = vmul.f32 %v67_v34, %v36_v11 }
  0x2b   :  { %v69_v36 = vmul.f32 %v53_v33, %v25_v0 }
  0x2c   :  { %v70_v37 = vmul.f32 %v68_v35, %v26_v1 }
  0x2d   :  { %71 = vst [vmem:[#allocation5] sm:$0xff] %v69_v36 }
  0x2e   :  { %72 = vst [vmem:[#allocation5 + $0x8] sm:$0xff] %v70_v37 }
  0x2f   :  { %85 = dma.vmem_to_hbm [thread:$0]  %s78_s13, 256, %s80_s16, [#allocation4], %s157_s11, %s157_s11, %s158_s12  }
  0x30   :  { %154 = dma.done.wait [#allocation4], 256  }
  0x31   :  { %155 = vsyncadd [#allocation4], 4294967040 }
  0x32   :  { %90 = vsyncpa [#allocation3], 1 }
  0x33   :  { %91 = vsyncpa [#allocation4], 1 }

</bundles_post_ra>
